<compile_context>
chip_gen: v5e
topology: v5e:2x2
jax: 0.10.0
libtpu: 0.0.40
codegen_flags: <defaults>
</compile_context>

<pallas_src>
import math

import jax
import jax.numpy as jnp
from jax.experimental import pallas as pl
from jax.experimental.pallas import tpu as pltpu


def _cconv_gemm_kernel(w_ref, b_ref, p_ref, o_ref):
    # w_ref: (Cout2, K)        resident combined complex weight
    # b_ref: (Cout2, 1)        resident combined bias
    # p_ref: (K, th*Wout)      im2col patch tile (lane-dense minor dim)
    # o_ref: (Cout2, th*Wout)  output tile (lane-dense minor dim)
    acc = jnp.dot(w_ref[...], p_ref[...], preferred_element_type=jnp.float32)
    o_ref[...] = (acc + b_ref[...]).astype(o_ref.dtype)


def complex_conv2d(x, w_r, b_r, w_i, b_i, stride=(1, 1), padding=(0, 0)):
    """Pallas implementation of ComplexConv2D.forward.

    x: (B, Cin, H, W, 2).  w_r/w_i: (Cout, Cin, KH, KW).  b_r/b_i: (Cout,).
    Returns (B, Cout, Hout, Wout, 2) float32.
    """
    if isinstance(stride, int):
        stride = (stride, stride)
    if isinstance(padding, int):
        padding = (padding, padding)
    sh, sw = stride
    ph, pw = padding

    B, Cin, H, W, two = x.shape
    assert two == 2
    Cout, _, KH, KW = w_r.shape
    Cin2, Cout2 = 2 * Cin, 2 * Cout
    Kdim = KH * KW * Cin2

    Hout = (H + 2 * ph - KH) // sh + 1
    Wout = (W + 2 * pw - KW) // sw + 1
    M_total = B * Hout                              # output rows (across batch)

    # ---- combined complex weight / bias: one GEMM yields real & imag outputs
    wr_t = jnp.transpose(w_r, (2, 3, 1, 0))         # (KH, KW, Cin, Cout)
    wi_t = jnp.transpose(w_i, (2, 3, 1, 0))
    w_top = jnp.concatenate([wr_t, wi_t], axis=-1)   # real-input rows:  [ Wr |  Wi]
    w_bot = jnp.concatenate([-wi_t, wr_t], axis=-1)  # imag-input rows:  [-Wi |  Wr]
    w_comb = jnp.concatenate([w_top, w_bot], axis=2)  # (KH, KW, 2Cin, 2Cout)
    w_t = jnp.transpose(w_comb.reshape(Kdim, Cout2)).astype(jnp.float32)  # (Cout2, K)
    b_comb = jnp.concatenate([b_r - b_i, b_r + b_i]).reshape(Cout2, 1)
    b_comb = b_comb.astype(jnp.float32)

    # ---- im2col patches in transposed layout (K, B*Hout*Wout): M on lanes.
    # Channel order [real | imag]; K order (kh, kw, cin2) matches w_t columns.
    x2 = jnp.transpose(x, (4, 1, 0, 2, 3)).reshape(Cin2, B, H, W)
    x2 = jnp.pad(x2, ((0, 0), (0, 0), (ph, ph), (pw, pw)))
    taps = []
    for kh in range(KH):
        for kw in range(KW):
            taps.append(x2[:, :, kh:kh + sh * (Hout - 1) + 1:sh,
                              kw:kw + sw * (Wout - 1) + 1:sw])
    patches = jnp.concatenate(taps, axis=0)          # (K, B, Hout, Wout)
    patches = patches.reshape(Kdim, M_total * Wout).astype(jnp.float32)

    # ---- M-tile selection: th output rows per grid step, th*Wout % 128 == 0
    def _round_up(a, b):
        return (a + b - 1) // b * b

    th_step = max(8, 128 // math.gcd(Wout, 128))     # keeps block minor dim %128==0
    th = _round_up(max(th_step, pl.cdiv(1024, Wout)), th_step)   # M_tile ~ 1-2K lanes
    th = min(th, _round_up(M_total, th_step))                    # don't exceed work
    if M_total >= 2 * th_step:                        # >=2 grid steps (v7x megacore)
        th = min(th, _round_up(pl.cdiv(M_total, 2), th_step))

    def _vmem_bytes(t):
        n = t * Wout
        patch_blk = _round_up(Kdim, 8) * n * 4
        out_blk = _round_up(Cout2, 8) * n * 4
        w_blk = _round_up(Cout2, 8) * _round_up(Kdim, 128) * 4
        return 2 * (patch_blk + out_blk) + 2 * w_blk + (1 << 20)

    while th > th_step and _vmem_bytes(th) > (36 << 20):   # fit v7x's 64 MiB/TC
        th -= th_step

    M_pad = _round_up(M_total, th)
    if M_pad > M_total:
        patches = jnp.pad(patches, ((0, 0), (0, (M_pad - M_total) * Wout)))
    n_steps = M_pad // th
    vmem_limit = min(48 << 20, max(int(1.5 * _vmem_bytes(th)), 16 << 20))

    flops = 2 * Cout2 * Kdim * M_pad * Wout
    bytes_accessed = 4 * (Cout2 * Kdim + Cout2
                          + Kdim * M_pad * Wout + Cout2 * M_pad * Wout)

    out_t = pl.pallas_call(
        _cconv_gemm_kernel,
        out_shape=jax.ShapeDtypeStruct((Cout2, M_pad * Wout), jnp.float32),
        grid=(n_steps,),
        in_specs=[
            pl.BlockSpec((Cout2, Kdim), lambda i: (0, 0)),       # resident weight
            pl.BlockSpec((Cout2, 1), lambda i: (0, 0)),          # resident bias
            pl.BlockSpec((Kdim, th * Wout), lambda i: (0, i)),   # patch tile
        ],
        out_specs=pl.BlockSpec((Cout2, th * Wout), lambda i: (0, i)),
        compiler_params=pltpu.CompilerParams(
            dimension_semantics=("parallel",),
            vmem_limit_bytes=vmem_limit),
        cost_estimate=pl.CostEstimate(
            flops=flops, transcendentals=0, bytes_accessed=bytes_accessed),
    )(w_t, b_comb, patches)

    # ---- unpack to the module's (B, Cout, Hout, Wout, 2) interface
    out_t = out_t[:, :M_total * Wout]
    out = out_t.reshape(2, Cout, B, Hout, Wout)
    return jnp.transpose(out, (2, 1, 3, 4, 0))


def complex_conv2d_ref(x, w_r, b_r, w_i, b_i, stride=(1, 1), padding=(0, 0)):
    """Pure-JAX reference mirroring the PyTorch forward exactly."""
    if isinstance(stride, int):
        stride = (stride, stride)
    if isinstance(padding, int):
        padding = (padding, padding)
    xr = x[..., 0]
    xi = x[..., 1]

    def conv(inp, w, b):
        out = jax.lax.conv_general_dilated(
            inp, w, window_strides=stride,
            padding=[(padding[0], padding[0]), (padding[1], padding[1])],
            dimension_numbers=("NCHW", "OIHW", "NCHW"),
            precision=jax.lax.Precision.HIGHEST)
        return out + b[None, :, None, None]

    x_re = conv(xr, w_r, b_r) - conv(xi, w_i, b_i)
    x_im = conv(xi, w_r, b_r) + conv(xr, w_i, b_i)
    return jnp.stack([x_re, x_im], axis=-1)


if __name__ == "__main__":
    B, Cin, Cout, H, W = 2, 4, 8, 16, 16
    KH = KW = 3

    key = jax.random.PRNGKey(0)
    kx, kwr, kbr, kwi, kbi = jax.random.split(key, 5)
    x = jax.random.normal(kx, (B, Cin, H, W, 2), dtype=jnp.float32)
    scale = 1.0 / float(Cin * KH * KW) ** 0.5
    w_r = scale * jax.random.normal(kwr, (Cout, Cin, KH, KW), dtype=jnp.float32)
    b_r = scale * jax.random.normal(kbr, (Cout,), dtype=jnp.float32)
    w_i = scale * jax.random.normal(kwi, (Cout, Cin, KH, KW), dtype=jnp.float32)
    b_i = scale * jax.random.normal(kbi, (Cout,), dtype=jnp.float32)

    # stride-1, padding-1 (same-size output)
    out = complex_conv2d(x, w_r, b_r, w_i, b_i, stride=(1, 1), padding=(1, 1))
    out = jax.block_until_ready(out)
    ref = complex_conv2d_ref(x, w_r, b_r, w_i, b_i, stride=(1, 1), padding=(1, 1))
    assert out.shape == (B, Cout, H, W, 2), out.shape
    err = float(jnp.max(jnp.abs(out - ref)))
    assert jnp.allclose(out, ref, atol=1e-4, rtol=1e-4), f"stride-1 mismatch, max|err|={err}"

    # strided case: stride handled in the im2col slicing, no wasted compute
    out2 = complex_conv2d(x, w_r, b_r, w_i, b_i, stride=(2, 2), padding=(1, 1))
    out2 = jax.block_until_ready(out2)
    ref2 = complex_conv2d_ref(x, w_r, b_r, w_i, b_i, stride=(2, 2), padding=(1, 1))
    assert out2.shape == ref2.shape, (out2.shape, ref2.shape)
    err2 = float(jnp.max(jnp.abs(out2 - ref2)))
    assert jnp.allclose(out2, ref2, atol=1e-4, rtol=1e-4), f"stride-2 mismatch, max|err|={err2}"

    print("KERNEL_OK")
</pallas_src>

<mosaic_0001>
module attributes {stable_mosaic.version = 11 : i64} {
  func.func @_cconv_gemm_kernel(%arg0: i32, %arg1: memref<16x72xf32, #tpu.memory_space<vmem>>, %arg2: memref<16x1xf32, #tpu.memory_space<vmem>>, %arg3: memref<72x256xf32, #tpu.memory_space<vmem>>, %arg4: memref<16x256xf32, #tpu.memory_space<vmem>>) attributes {dimension_semantics = [#tpu.dimension_semantics<parallel>], iteration_bounds = array<i64: 2>, scalar_prefetch = 0 : i64, scratch_operands = 0 : i64, tpu.core_type = #tpu.core_type<tc>, window_params = [{pipeline_mode = #tpu.pipeline_mode<synchronous>, transform_indices = @transform_0, window_bounds = array<i64: 16, 72>}, {pipeline_mode = #tpu.pipeline_mode<synchronous>, transform_indices = @transform_1, window_bounds = array<i64: 16, 1>}, {transform_indices = @transform_2, window_bounds = array<i64: 72, 256>}, {transform_indices = @transform_3, window_bounds = array<i64: 16, 256>}]} {
    %c0 = arith.constant 0 : index
    %c0_0 = arith.constant 0 : index
    %0 = vector.load %arg1[%c0, %c0_0] : memref<16x72xf32, #tpu.memory_space<vmem>>, vector<16x72xf32>
    %c0_1 = arith.constant 0 : index
    %c0_2 = arith.constant 0 : index
    %1 = vector.load %arg3[%c0_1, %c0_2] : memref<72x256xf32, #tpu.memory_space<vmem>>, vector<72x256xf32>
    %cst = arith.constant dense<0.000000e+00> : vector<16x256xf32>
    %2 = tpu.matmul %0, %1, %cst {dimension_numbers = #tpu.dot_dimension_numbers<[1], [0], [0], [1], [0, 0, 1, 1], [], []>} : vector<16x72xf32>, vector<72x256xf32>, vector<16x256xf32> -> vector<16x256xf32>
    %c0_3 = arith.constant 0 : index
    %c0_4 = arith.constant 0 : index
    %3 = vector.load %arg2[%c0_3, %c0_4] : memref<16x1xf32, #tpu.memory_space<vmem>>, vector<16x1xf32>
    %4 = vector.broadcast %3 : vector<16x1xf32> to vector<16x256xf32>
    %5 = arith.addf %2, %4 : vector<16x256xf32>
    %c0_5 = arith.constant 0 : index
    %c0_6 = arith.constant 0 : index
    %6 = vector.load %arg4[%c0_5, %c0_6] : memref<16x256xf32, #tpu.memory_space<vmem>>, vector<16x256xf32>
    tpu.vector_store %arg4[%c0_5, %c0_6], %5 {strides = array<i32>} : memref<16x256xf32, #tpu.memory_space<vmem>>, vector<16x256xf32>,
    return
  }
  func.func @transform_0(%arg0: i32) -> (i32, i32) {
    %c0_i32 = arith.constant 0 : i32
    %c0_i32_0 = arith.constant 0 : i32
    %c0_i32_1 = arith.constant 0 : i32
    return %c0_i32, %c0_i32_0 : i32, i32
  }
  func.func @transform_1(%arg0: i32) -> (i32, i32) {
    %c0_i32 = arith.constant 0 : i32
    %c0_i32_0 = arith.constant 0 : i32
    %c0_i32_1 = arith.constant 0 : i32
    return %c0_i32, %c0_i32_0 : i32, i32
  }
  func.func @transform_2(%arg0: i32) -> (i32, i32) {
    %c0_i32 = arith.constant 0 : i32
    %c0_i32_0 = arith.constant 0 : i32
    return %c0_i32, %arg0 : i32, i32
  }
  func.func @transform_3(%arg0: i32) -> (i32, i32) {
    %c0_i32 = arith.constant 0 : i32
    %c0_i32_0 = arith.constant 0 : i32
    return %c0_i32, %arg0 : i32, i32
  }
}

</mosaic_0001>

<bundles_post_ra>
// kernel: tpu_custom_call.1
= control target key start
LH: loop header
LB: loop body
LE: loop exit
PB: predicated region body
PF: predicated region fallthrough
CT: control target
= control target key end

     0   :  { %8 = vsyncpa [#allocation3], 0  ;;  %s740_s0 = inlined_call_operand.vmem [shape: f32[16,72], index: 0, kind: input, shape index: {}]   ;;  %s741_s1 = inlined_call_operand.vmem [shape: f32[16,1], index: 1, kind: input, shape index: {}]   ;;  %s742_s2 = inlined_call_operand.hbm [shape: f32[72,512], index: 2, kind: input, shape index: {}]   ;;  %s743_s3 = inlined_call_operand.hbm [shape: f32[16,512], index: 3, kind: output, shape index: {}]  }
   0x1   :  { %10 = vsyncpa [#allocation3 + $0x1], 0 }
   0x2   :  { %11 = vsyncpa [#allocation4], 0 }
   0x3   :  { %13 = vsyncpa [#allocation4 + $0x1], 0  ;;  %s588_s12 = smov 0   ;;  %s590_s13 = smov 0  }
   0x4   :  { %s592_s14 = smov 0   ;;  %s594_s15 = smov 0  }
   0x5 LB: > { %s609_s16 = sadd.s32 4294967295, %s559_s15   ;;  %s371_s17 = sadd.s32 4294967294, %s559_s15   ;;  %s559_s15 = sphi %s594_s15, %s751_s15   ;;  %s555_s14 = sphi %s592_s14, %s750_s14   ;;  %s551_s13 = sphi %s590_s13, %s749_s13   ;;  %s547_s12 = sphi %s588_s12, %s748_s12  }
   0x6   : > { %s613_s18 = sadd.s32 1, %s559_s15   ;;  %s68_s19 = sadd.s32 1, %s555_s14 }
   0x7   : > { %s65_s20 = ssub.s32 %s559_s15, %s613_s18  ;;  %p75_p0 = scmp.ne.s32.totalorder %s555_s14, %s551_s13 }
   0x8   : > { %p66_p1 = scmp.eq.s32.totalorder %s65_s20, 0  ;;  %p76_p2 = scmp.eq.s32.totalorder %s559_s15, 0 }
   0x9   : > { %p81_p3 = scmp.ne.s32.totalorder %s551_s13, %s547_s12  ;;  %p82_p4 = scmp.eq.s32.totalorder %s609_s16, 0 }
   0xa   : > { %s625_s21 = scalar_select %p66_p1, %s555_s14, %s68_s19  }
   0xb   : > { %p77_p5 = por %p76_p2, %p75_p0  ;;  %p627_p6 = por %p82_p4, %p81_p3 }
   0xc   : > { %p105_p7 = scmp.eq.s32.totalorder %s609_s16, 1  ;;  %p111_p8 = scmp.eq.s32.totalorder %s371_s17, 1 }
   0xd   : > { %p373_p9 = scmp.ge.s32.totalorder %s559_s15, 2  ;;  %p421_p10 = scmp.lt.s32.totalorder %s559_s15, 2 }
   0xe   : > { %p634_p11 = por %p105_p7, %p75_p0  ;;  %p638_p12 = por %p111_p8, %p81_p3 }
   0xf   : > { %s137_s25 = sand.u32 1, %s555_s14   ;;  %s387_s26 = sshll.u32 %s559_s15, 4 }
  0x10   : > { %s407_s27 = smul.u32 144, %s137_s25  ;;  %s146_s30 = scalar_lea.hbm %s742_s2, %s387_s26 }
  0x11   : > { %p647_p13 = pnand %p421_p10, %p77_p5  ;;  %s147_s5 = sshll.u32 %s146_s30, 4  ;;  %s148_s5 = int_to_ptr.hbm [resolvable:$true] %s147_s5 }
  0x12   : > { %s141_s6 = scalar_lea.vmem [#allocation2], %s407_s27  ;;  %p376_p0 = scmp.ge.s32.totalorder %s559_s15, 1 }
  0x13   : > { %s149_s7 = sshll.u32 %s141_s6, 4  ;;  %s138_s8 = scalar_lea.sflag [#allocation3], %s137_s25  ;;  %s150_s7 = int_to_ptr.vmem [resolvable:$true] %s149_s7 }
  0x14   : > { %s463_s9 = sshra.s32 %s148_s5, 4  ;;  %p467_p2 = pneg %p647_p13  ;;  %s464_s9 = int_to_ptr.hbm [resolvable:$true] %s463_s9 }
  0x15   : > { %s465_s10 = scalar_lea.hbm %s464_s9, 144  ;;  %s470_s19 = scalar_lea.hbm %s742_s2, 288 }
  0x16   : > { %p466_p1 = scmp.ne.s32.totalorder %s464_s9, %s465_s10  ;;  %p471_p5 = scmp.lt.s32.totalorder %s464_s9, %s742_s2 }
  0x17   : > { %p472_p7 = scmp.lt.s32.totalorder %s470_s19, %s465_s10 }
  0x18   : > { %p468_p3 = pnand %p467_p2, %p466_p1 }
  0x19   : > { %p473_p8 = por %p472_p7, %p471_p5 }
  0x1a   : > { %p469_p4 = pneg %p468_p3 }
  0x1c   : > { %p474_p10 = pnand %p473_p8, %p469_p4 }
  0x1e   : > { %477 = shalt.err (!%p474_p10)
}
  0x1f   : > { %s561_s25 = smov 512   ;;  %s562_s27 = smov 256  }
  0x20   : > { %s563_s28 = smov 16   ;;  %p157_p1 = scmp.lt.s32.totalorder %s559_s15, 3 }
  0x21   : > { %416 = dma.hbm_to_vmem [thread:$0]  (!%p647_p13), %s148_s5, 2304, %s150_s7, %s138_s8, %s561_s25, %s562_s27, %s563_s28  }
  0x22   : > { %p158_p2 = pnand %p376_p0, %p157_p1 }
  0x23   : > { %s666_s29 = sand.u32 (!%p158_p2), 1, %s551_s13  }
  0x24   : > { %161 = sbr.rel (%p158_p2) target bundleno = 202 (0xca), region = 32  ;;  %s164_s6 = scalar_lea.sflag (!%p158_p2), [#allocation3], %s666_s29 }
  0x25   : > { %s408_s30 = smul.u32 (!%p158_p2), 144, %s666_s29 }
  0x27   : > { %s670_s9 = scalar_lea.vmem (!%p158_p2), [#allocation2], %s408_s30 }
  0x29   : > { %538 = dma.done.wait (%p627_p6), %s164_s6, 2304  }
  0x2a   : > { %540 = vsyncadd (%p627_p6), %s164_s6, 4294964992  ;;  %v564_v0 = vmov 0   ;;  %v211_v1 = vld [vmem:[%s670_s9 + $0x80] sm:$0xff]  ;;  %v212_v2 = vld [vmem:[%s670_s9 + $0x88] sm:$0xff]  ;;  %vm225_vm0 = vcmask 588800   ;;  %s377_s19 = sshll.u32 %s666_s29, 5 }
  0x2b   : > { %462 = vset.pattern.permute.xlu0 %v564_v0  ;;  %v209_v3 = vld [vmem:[%s670_s9 + $0x70] sm:$0xff]  ;;  %239 = vmatpush.msra.mxu0 %v211_v1  ;;  %v210_v4 = vld [vmem:[%s670_s9 + $0x78] sm:$0xff]  ;;  %v207_v5 = vld [vmem:[%s670_s9 + $0x60] sm:$0xff]  ;;  %s388_s20 = sshll.u32 %s609_s16, 4  ;;  %s190_s28 = scalar_lea.vmem [#allocation5], %s377_s19 }
  0x2c   : > { %389 = vmatpush.msra.mxu2 %v211_v1  ;;  %262 = vmatpush.msra.mxu1 %v212_v2  ;;  %v208_v6 = vld [vmem:[%s670_s9 + $0x68] sm:$0xff]  ;;  %v205_v7 = vld [vmem:[%s670_s9 + $0x50] sm:$0xff]  ;;  %v206_v8 = vld [vmem:[%s670_s9 + $0x58] sm:$0xff]  ;;  %s294_s27 = scalar_lea.hbm %s743_s3, %s388_s20  ;;  %s295_s30 = sshll.u32 %s190_s28, 4  ;;  %s296_s30 = int_to_ptr.vmem [resolvable:$true] %s295_s30 }
  0x2d   : > { %398 = vmatpush.msra.mxu3 %v212_v2  ;;  %240 = vmatpush.msra.mxu0 %v209_v3  ;;  %v203_v9 = vld [vmem:[%s670_s9 + $0x40] sm:$0xff]  ;;  %v204_v10 = vld [vmem:[%s670_s9 + $0x48] sm:$0xff]  ;;  %v201_v11 = vld [vmem:[%s670_s9 + $0x30] sm:$0xff]  ;;  %s297_s6 = sshll.u32 %s294_s27, 4  ;;  %s283_s16 = scalar_lea.sflag [#allocation4], %s666_s29  ;;  %s298_s6 = int_to_ptr.hbm [resolvable:$true] %s297_s6 }
  0x2e   : > { %390 = vmatpush.msra.mxu2 %v209_v3  ;;  %263 = vmatpush.msra.mxu1 %v210_v4  ;;  %v202_v12 = vld [vmem:[%s670_s9 + $0x38] sm:$0xff]  ;;  %v199_v13 = vld [vmem:[%s670_s9 + $0x20] sm:$0xff]  ;;  %v200_v14 = vld [vmem:[%s670_s9 + $0x28] sm:$0xff]  ;;  %s513_s7 = scalar_lea.hbm %s743_s3, 64 }
  0x2f   : > { %399 = vmatpush.msra.mxu3 %v210_v4  ;;  %241 = vmatpush.msra.mxu0 %v207_v5  ;;  %v197_v15 = vld [vmem:[%s670_s9 + $0x10] sm:$0xff]  ;;  %v198_v16 = vld [vmem:[%s670_s9 + $0x18] sm:$0xff]  ;;  %v195_v17 = vld [vmem:[%s670_s9] sm:$0xff] }
  0x30   : > { %391 = vmatpush.msra.mxu2 %v207_v5  ;;  %264 = vmatpush.msra.mxu1 %v208_v6  ;;  %v196_v18 = vld [vmem:[%s670_s9 + $0x8] sm:$0xff]  ;;  %v193_v19 = vld [vmem:[%s740_s0] sm:$0xff]  ;;  %s507_s9 = sshra.s32 %s298_s6, 4  ;;  %s508_s9 = int_to_ptr.hbm [resolvable:$true] %s507_s9 }
  0x31   : > { %400 = vmatpush.msra.mxu3 %v208_v6  ;;  %242 = vmatpush.msra.mxu0 %v205_v7  ;;  %v194_v20 = vld [vmem:[%s740_s0 + $0x8] sm:$0xff]  ;;  %v213_v21 = vld [vmem:[%s741_s1] sm:$0xff]  ;;  %s509_s22 = scalar_lea.hbm %s508_s9, 32  ;;  %p514_p3 = scmp.lt.s32.totalorder %s508_s9, %s743_s3 }
  0x32   : > { %392 = vmatpush.msra.mxu2 %v205_v7  ;;  %265 = vmatpush.msra.mxu1 %v206_v8  ;;  %v214_v22 = vld [vmem:[%s741_s1 + $0x8] sm:$0xff]  ;;  %p510_p6 = scmp.ne.s32.totalorder %s508_s9, %s509_s22  ;;  %p515_p4 = scmp.lt.s32.totalorder %s513_s7, %s509_s22 }
  0x33   : > { %401 = vmatpush.msra.mxu3 %v206_v8  ;;  %243 = vmatpush.msra.mxu0 %v203_v9 }
  0x34   : > { %393 = vmatpush.msra.mxu2 %v203_v9  ;;  %266 = vmatpush.msra.mxu1 %v204_v10  ;;  %p511_p13 = pnand %p510_p6, %p634_p11  ;;  %p516_p5 = por %p515_p4, %p514_p3 }
  0x35   : > { %402 = vmatpush.msra.mxu3 %v204_v10  ;;  %244 = vmatpush.msra.mxu0 %v201_v11 }
  0x36   : > { %394 = vmatpush.msra.mxu2 %v201_v11  ;;  %267 = vmatpush.msra.mxu1 %v202_v12  ;;  %p512_p0 = pneg %p511_p13 }
  0x37   : > { %403 = vmatpush.msra.mxu3 %v202_v12  ;;  %245 = vmatpush.msra.mxu0 %v199_v13 }
  0x38   : > { %395 = vmatpush.msra.mxu2 %v199_v13  ;;  %268 = vmatpush.msra.mxu1 %v200_v14  ;;  %p517_p7 = pnand %p516_p5, %p512_p0 }
  0x39   : > { %404 = vmatpush.msra.mxu3 %v200_v14  ;;  %246 = vmatpush.msra.mxu0 %v197_v15 }
  0x3a   : > { %396 = vmatpush.msra.mxu2 %v197_v15  ;;  %269 = vmatpush.msra.mxu1 %v198_v16 }
  0x3b   : > { %405 = vmatpush.msra.mxu3 %v198_v16  ;;  %247 = vmatpush.msra.mxu0 %v195_v17 }
  0x3c   : > { %397 = vmatpush.msra.mxu2 %v195_v17  ;;  %270 = vmatpush.msra.mxu1 %v196_v18 }
  0x3d   : > { %406 = vmatpush.msra.mxu3 %v196_v18  ;;  %378 = vmatmul.msk.f32.vlgmr.msra.gmra.mxu0 %vm225_vm0, %v193_v19 }
  0x3e   : > { %379 = vmatmul.msk.f32.vlgmr.msra.gmra.mxu2 %vm225_vm0, %v194_v20  ;;  %380 = vmatmul.msk.f32.vlgmr.msra.gmra.mxu1 %vm225_vm0, %v193_v19 }
  0x3f   : > { %381 = vmatmul.msk.f32.vlgmr.msra.gmra.mxu3 %vm225_vm0, %v194_v20  ;;  %217 = vperm.xlu0 %462, %v213_v21  }
  0x47   : > { %222 = vperm.xlu0 %462, %v214_v22  }
  0xb1   : > { %v218_v23 = vpop.permute.xlu0 %217 }
  0xb9   : > { %v223_v28 = vpop.permute.xlu0 %222 }
  0xba   : > { %v249_v24 = vpop.f32.mrf.mxu0 }
  0xbb   : > { %v250_v25 = vadd.f32 %v249_v24, %v218_v23  ;;  %v272_v26 = vpop.f32.mrf.mxu1 }
  0xbc   : > { %v273_v27 = vadd.f32 %v272_v26, %v218_v23 }
  0xbd   : > { %278 = vst [vmem:[%s190_s28] sm:$0xff] %v250_v25 }
  0xbe   : > { %279 = vst [vmem:[%s190_s28 + $0x8] sm:$0xff] %v273_v27 }
  0xc1   : > { %v252_v29 = vpop.f32.mrf.mxu2 }
  0xc2   : > { %v253_v30 = vadd.f32 %v252_v29, %v223_v28  ;;  %v275_v31 = vpop.f32.mrf.mxu3 }
  0xc3   : > { %v276_v32 = vadd.f32 %v275_v31, %v223_v28 }
  0xc4   : > { %280 = vst [vmem:[%s190_s28 + $0x10] sm:$0xff] %v253_v30 }
  0xc5   : > { %281 = vst [vmem:[%s190_s28 + $0x18] sm:$0xff] %v276_v32 }
  0xc6   : > { %520 = shalt.err (!%p517_p7)
}
  0xc7   : > { %s565_s29 = smov 256   ;;  %s566_s11 = smov 512  }
  0xc8   : > { %s567_s17 = smov 16  }
  0xc9   : > { %411 = dma.vmem_to_hbm [thread:$0]  (%p634_p11), %s296_s30, 512, %s298_s6, %s283_s16, %s565_s29, %s566_s11, %s567_s17  }
  0xca PF: > { %s312_s19 = sand.u32 1, %s547_s12   ;;  %p418_p8 = pnand %p373_p9, %p638_p12 }
  0xcb   : > { %s313_s20 = scalar_lea.sflag [#allocation4], %s312_s19 }
  0xcc   : > { %p419_p10 = pneg %p418_p8 }
  0xce   : > { %542 = dma.done.wait (%p419_p10), %s313_s20, 512  }
  0xcf   : > { %544 = vsyncadd (%p419_p10), %s313_s20, 4294966784  ;;  %p16_p1 = scmp.ge.s32.totalorder %s613_s18, 4   ;;  %s748_s12 = smov %s551_s13 }
  0xd0   : > { %s749_s13 = smov %s555_s14  ;;  %s750_s14 = smov %s625_s21 }
  0xd1   : > { %s751_s15 = smov %s613_s18  ;;  %18 = sbr.rel (!%p16_p1) target bundleno = 5 (0x5), region = 77 }
  0xd6   :  { %319 = vsyncpa [#allocation3], 1 }
  0xd7   :  { %321 = vsyncpa [#allocation3 + $0x1], 1 }
  0xd8   :  { %322 = vsyncpa [#allocation4], 1 }
  0xd9   :  { %324 = vsyncpa [#allocation4 + $0x1], 1 }

</bundles_post_ra>
